<compile_context>
chip_gen: v7x
topology: tpu7x:2x2x1
jax: 0.10.0
libtpu: 0.0.40
codegen_flags: <defaults>
</compile_context>

<pallas_src>
import jax
import jax.numpy as jnp
from jax.experimental import pallas as pl
from jax.experimental.pallas import tpu as pltpu


def _round_up(x, m):
    return ((x + m - 1) // m) * m


def _make_fused_mlp_kernel(num_layers):
    """Kernel over one batch tile: act -> (dot + bias + relu) x num_layers."""

    def kernel(*refs):
        x_ref = refs[0]
        w_refs = refs[1:1 + num_layers]
        b_refs = refs[1 + num_layers:1 + 2 * num_layers]
        o_ref = refs[1 + 2 * num_layers]

        act = x_ref[...].astype(jnp.float32)
        # Static Python unroll over layers: activations stay in vregs/VMEM,
        # never written back to HBM between layers.
        for l in range(num_layers):
            y = jnp.dot(act, w_refs[l][...],
                        preferred_element_type=jnp.float32)   # MXU
            act = jnp.maximum(y + b_refs[l][...], 0.0)         # VPU epilogue
        o_ref[...] = act.astype(o_ref.dtype)

    return kernel


def fc_generator_relu_pallas(x, params, *, batch_tile=128):
    """Fused forward of FcGeneratorReLu: relu(x @ W + b) for every layer.

    x:      [B, input_size]
    params: list of (w [in, out], b [out]) per layer.
    """
    B, Din = x.shape
    num_layers = len(params)
    dims = [Din] + [w.shape[1] for w, _ in params]

    # Lane-dense padding: features -> multiple of 128, batch -> multiple of 8,
    # then to a multiple of the batch tile.
    padded = [_round_up(d, 128) for d in dims]
    B_pad = _round_up(B, 8)
    tm = min(batch_tile, B_pad)
    B_pad = _round_up(B_pad, tm)

    xp = jnp.pad(x, ((0, B_pad - B), (0, padded[0] - Din)))
    wps, bps = [], []
    for l, (w, b) in enumerate(params):
        pin, pout = padded[l], padded[l + 1]
        wps.append(jnp.pad(w, ((0, pin - w.shape[0]), (0, pout - w.shape[1]))))
        bps.append(jnp.pad(b, (0, pout - b.shape[0])).reshape(1, pout))

    grid = (B_pad // tm,)

    # x tiled over batch; every W / b is a resident block (constant index_map).
    in_specs = [pl.BlockSpec((tm, padded[0]), lambda i: (i, 0))]
    for l in range(num_layers):
        in_specs.append(
            pl.BlockSpec((padded[l], padded[l + 1]), lambda i: (0, 0)))
    for l in range(num_layers):
        in_specs.append(pl.BlockSpec((1, padded[l + 1]), lambda i: (0, 0)))
    out_spec = pl.BlockSpec((tm, padded[-1]), lambda i: (i, 0))

    itemsize = jnp.dtype(x.dtype).itemsize
    f32_size = 4
    flops = sum(2 * B_pad * padded[l] * padded[l + 1]
                for l in range(num_layers))
    bytes_accessed = (xp.size * itemsize
                      + sum(w.size * itemsize for w in wps)
                      + sum(b.size * itemsize for b in bps)
                      + B_pad * padded[-1] * itemsize)

    # Rough resident-VMEM estimate: weights + biases (single-buffered, constant
    # index_map), double-buffered x/out batch tiles, plus the widest f32
    # activation pair live inside the kernel body.
    widest = max(padded)
    vmem_needed = (sum(w.size for w in wps) * itemsize
                   + sum(b.size for b in bps) * itemsize
                   + 2 * tm * padded[0] * itemsize
                   + 2 * tm * padded[-1] * itemsize
                   + 2 * tm * widest * f32_size)
    vmem_limit = None
    if vmem_needed > 24 * 1024 * 1024:  # leave headroom under default ~32 MiB
        vmem_limit = min(int(vmem_needed * 1.5) + (4 << 20), 64 << 20)

    compiler_params = pltpu.CompilerParams(
        dimension_semantics=("parallel",),
        vmem_limit_bytes=vmem_limit,
    )

    out_padded = pl.pallas_call(
        _make_fused_mlp_kernel(num_layers),
        out_shape=jax.ShapeDtypeStruct((B_pad, padded[-1]), x.dtype),
        grid_spec=pltpu.PrefetchScalarGridSpec(
            num_scalar_prefetch=0,
            grid=grid,
            in_specs=in_specs,
            out_specs=out_spec,
        ),
        compiler_params=compiler_params,
        cost_estimate=pl.CostEstimate(
            flops=flops, transcendentals=0, bytes_accessed=bytes_accessed),
    )(xp, *wps, *bps)

    # Slice off batch/feature padding.
    return out_padded[:B, :dims[-1]]


def init_fc_generator_params(key, input_size, output_size, hidden_dims,
                             dtype=jnp.float32):
    """Deterministic init mimicking nn.Linear's U(-1/sqrt(fan_in), 1/sqrt(fan_in)).

    Weights are stored as [in, out] (transposed relative to PyTorch)."""
    dims = [input_size] + list(hidden_dims) + [output_size]
    params = []
    for i in range(len(dims) - 1):
        fan_in, fan_out = dims[i], dims[i + 1]
        key, kw, kb = jax.random.split(key, 3)
        bound = 1.0 / jnp.sqrt(float(fan_in))
        w = jax.random.uniform(kw, (fan_in, fan_out), dtype, -bound, bound)
        b = jax.random.uniform(kb, (fan_out,), dtype, -bound, bound)
        params.append((w, b))
    return params


@jax.jit
def fc_generator_relu_forward(x, params):
    """Forward pass of FcGeneratorReLu: (Linear -> ReLU) for every layer,
    including the final output layer (matches the PyTorch module exactly)."""
    return fc_generator_relu_pallas(x, params)


def _reference_forward(x, params):
    out = x
    for w, b in params:
        out = jnp.maximum(out @ w + b, 0.0)
    return out


if __name__ == "__main__":
    key = jax.random.PRNGKey(0)

    # Small shapes consistent with the module: x is [batch, input_size].
    batch = 8
    input_size = 32
    hidden_dims = [64, 48]
    output_size = 16

    key, kx, kp = jax.random.split(key, 3)
    x = jax.random.normal(kx, (batch, input_size), dtype=jnp.float32)
    params = init_fc_generator_params(kp, input_size, output_size, hidden_dims)

    out = fc_generator_relu_forward(x, params)
    out = jax.block_until_ready(out)

    ref = _reference_forward(x, params)
    assert out.shape == (batch, output_size)
    assert jnp.allclose(out, ref, atol=1e-5, rtol=1e-5)

    print("KERNEL_OK")
</pallas_src>

<mosaic_0001>
module attributes {stable_mosaic.version = 11 : i64} {
  func.func @kernel(%arg0: i32, %arg1: memref<8x128xf32, #tpu.memory_space<vmem>>, %arg2: memref<128x128xf32, #tpu.memory_space<vmem>>, %arg3: memref<128x128xf32, #tpu.memory_space<vmem>>, %arg4: memref<128x128xf32, #tpu.memory_space<vmem>>, %arg5: memref<1x128xf32, #tpu.memory_space<vmem>>, %arg6: memref<1x128xf32, #tpu.memory_space<vmem>>, %arg7: memref<1x128xf32, #tpu.memory_space<vmem>>, %arg8: memref<8x128xf32, #tpu.memory_space<vmem>>) attributes {dimension_semantics = [#tpu.dimension_semantics<parallel>], iteration_bounds = array<i64: 1>, scalar_prefetch = 0 : i64, scratch_operands = 0 : i64, tpu.core_type = #tpu.core_type<tc>, window_params = [{transform_indices = @transform_0, window_bounds = array<i64: 8, 128>}, {pipeline_mode = #tpu.pipeline_mode<synchronous>, transform_indices = @transform_1, window_bounds = array<i64: 128, 128>}, {pipeline_mode = #tpu.pipeline_mode<synchronous>, transform_indices = @transform_2, window_bounds = array<i64: 128, 128>}, {pipeline_mode = #tpu.pipeline_mode<synchronous>, transform_indices = @transform_3, window_bounds = array<i64: 128, 128>}, {pipeline_mode = #tpu.pipeline_mode<synchronous>, transform_indices = @transform_4, window_bounds = array<i64: 1, 128>}, {pipeline_mode = #tpu.pipeline_mode<synchronous>, transform_indices = @transform_5, window_bounds = array<i64: 1, 128>}, {pipeline_mode = #tpu.pipeline_mode<synchronous>, transform_indices = @transform_6, window_bounds = array<i64: 1, 128>}, {transform_indices = @transform_7, window_bounds = array<i64: 8, 128>}]} {
    %c0 = arith.constant 0 : index
    %c0_0 = arith.constant 0 : index
    %0 = vector.load %arg1[%c0, %c0_0] : memref<8x128xf32, #tpu.memory_space<vmem>>, vector<8x128xf32>
    %c0_1 = arith.constant 0 : index
    %c0_2 = arith.constant 0 : index
    %1 = vector.load %arg2[%c0_1, %c0_2] : memref<128x128xf32, #tpu.memory_space<vmem>>, vector<128x128xf32>
    %cst = arith.constant dense<0.000000e+00> : vector<8x128xf32>
    %2 = tpu.matmul %0, %1, %cst {dimension_numbers = #tpu.dot_dimension_numbers<[1], [0], [0], [1], [0, 0, 1, 1], [], []>} : vector<8x128xf32>, vector<128x128xf32>, vector<8x128xf32> -> vector<8x128xf32>
    %c0_3 = arith.constant 0 : index
    %c0_4 = arith.constant 0 : index
    %3 = vector.load %arg5[%c0_3, %c0_4] : memref<1x128xf32, #tpu.memory_space<vmem>>, vector<1x128xf32>
    %4 = vector.broadcast %3 : vector<1x128xf32> to vector<8x128xf32>
    %5 = arith.addf %2, %4 : vector<8x128xf32>
    %cst_5 = arith.constant 0.000000e+00 : f32
    %6 = vector.broadcast %cst_5 : f32 to vector<8x128xf32>
    %7 = arith.maximumf %5, %6 : vector<8x128xf32>
    %c0_6 = arith.constant 0 : index
    %c0_7 = arith.constant 0 : index
    %8 = vector.load %arg3[%c0_6, %c0_7] : memref<128x128xf32, #tpu.memory_space<vmem>>, vector<128x128xf32>
    %cst_8 = arith.constant dense<0.000000e+00> : vector<8x128xf32>
    %9 = tpu.matmul %7, %8, %cst_8 {dimension_numbers = #tpu.dot_dimension_numbers<[1], [0], [0], [1], [0, 0, 1, 1], [], []>} : vector<8x128xf32>, vector<128x128xf32>, vector<8x128xf32> -> vector<8x128xf32>
    %c0_9 = arith.constant 0 : index
    %c0_10 = arith.constant 0 : index
    %10 = vector.load %arg6[%c0_9, %c0_10] : memref<1x128xf32, #tpu.memory_space<vmem>>, vector<1x128xf32>
    %11 = vector.broadcast %10 : vector<1x128xf32> to vector<8x128xf32>
    %12 = arith.addf %9, %11 : vector<8x128xf32>
    %cst_11 = arith.constant 0.000000e+00 : f32
    %13 = vector.broadcast %cst_11 : f32 to vector<8x128xf32>
    %14 = arith.maximumf %12, %13 : vector<8x128xf32>
    %c0_12 = arith.constant 0 : index
    %c0_13 = arith.constant 0 : index
    %15 = vector.load %arg4[%c0_12, %c0_13] : memref<128x128xf32, #tpu.memory_space<vmem>>, vector<128x128xf32>
    %cst_14 = arith.constant dense<0.000000e+00> : vector<8x128xf32>
    %16 = tpu.matmul %14, %15, %cst_14 {dimension_numbers = #tpu.dot_dimension_numbers<[1], [0], [0], [1], [0, 0, 1, 1], [], []>} : vector<8x128xf32>, vector<128x128xf32>, vector<8x128xf32> -> vector<8x128xf32>
    %c0_15 = arith.constant 0 : index
    %c0_16 = arith.constant 0 : index
    %17 = vector.load %arg7[%c0_15, %c0_16] : memref<1x128xf32, #tpu.memory_space<vmem>>, vector<1x128xf32>
    %18 = vector.broadcast %17 : vector<1x128xf32> to vector<8x128xf32>
    %19 = arith.addf %16, %18 : vector<8x128xf32>
    %cst_17 = arith.constant 0.000000e+00 : f32
    %20 = vector.broadcast %cst_17 : f32 to vector<8x128xf32>
    %21 = arith.maximumf %19, %20 : vector<8x128xf32>
    %c0_18 = arith.constant 0 : index
    %c0_19 = arith.constant 0 : index
    %22 = vector.load %arg8[%c0_18, %c0_19] : memref<8x128xf32, #tpu.memory_space<vmem>>, vector<8x128xf32>
    tpu.vector_store %arg8[%c0_18, %c0_19], %21 {strides = array<i32>} : memref<8x128xf32, #tpu.memory_space<vmem>>, vector<8x128xf32>,
    return
  }
  func.func @transform_0(%arg0: i32) -> (i32, i32) {
    %c0_i32 = arith.constant 0 : i32
    %c0_i32_0 = arith.constant 0 : i32
    return %arg0, %c0_i32 : i32, i32
  }
  func.func @transform_1(%arg0: i32) -> (i32, i32) {
    %c0_i32 = arith.constant 0 : i32
    %c0_i32_0 = arith.constant 0 : i32
    %c0_i32_1 = arith.constant 0 : i32
    return %c0_i32, %c0_i32_0 : i32, i32
  }
  func.func @transform_2(%arg0: i32) -> (i32, i32) {
    %c0_i32 = arith.constant 0 : i32
    %c0_i32_0 = arith.constant 0 : i32
    %c0_i32_1 = arith.constant 0 : i32
    return %c0_i32, %c0_i32_0 : i32, i32
  }
  func.func @transform_3(%arg0: i32) -> (i32, i32) {
    %c0_i32 = arith.constant 0 : i32
    %c0_i32_0 = arith.constant 0 : i32
    %c0_i32_1 = arith.constant 0 : i32
    return %c0_i32, %c0_i32_0 : i32, i32
  }
  func.func @transform_4(%arg0: i32) -> (i32, i32) {
    %c0_i32 = arith.constant 0 : i32
    %c0_i32_0 = arith.constant 0 : i32
    %c0_i32_1 = arith.constant 0 : i32
    return %c0_i32, %c0_i32_0 : i32, i32
  }
  func.func @transform_5(%arg0: i32) -> (i32, i32) {
    %c0_i32 = arith.constant 0 : i32
    %c0_i32_0 = arith.constant 0 : i32
    %c0_i32_1 = arith.constant 0 : i32
    return %c0_i32, %c0_i32_0 : i32, i32
  }
  func.func @transform_6(%arg0: i32) -> (i32, i32) {
    %c0_i32 = arith.constant 0 : i32
    %c0_i32_0 = arith.constant 0 : i32
    %c0_i32_1 = arith.constant 0 : i32
    return %c0_i32, %c0_i32_0 : i32, i32
  }
  func.func @transform_7(%arg0: i32) -> (i32, i32) {
    %c0_i32 = arith.constant 0 : i32
    %c0_i32_0 = arith.constant 0 : i32
    return %arg0, %c0_i32 : i32, i32
  }
}

</mosaic_0001>

<bundles_post_ra>
// kernel: fc_generator_relu_forward.1
= control target key start
LH: loop header
LB: loop body
LE: loop exit
PB: predicated region body
PF: predicated region fallthrough
CT: control target
= control target key end

     0   :  { %v584_v3 = vmov 0.0|0.0   ;;  %vm585_vm0 = vmmov 0   ;;  %v586_v6 = vmov 0.0   ;;  %s826_s0 = inlined_call_operand.vmem [shape: f32[8,128], index: 0, kind: input, shape index: {}]   ;;  %s827_s1 = inlined_call_operand.vmem [shape: f32[128,128], index: 1, kind: input, shape index: {}]   ;;  %s828_s2 = inlined_call_operand.vmem [shape: f32[128,128], index: 2, kind: input, shape index: {}]   ;;  %s829_s3 = inlined_call_operand.vmem [shape: f32[128,128], index: 3, kind: input, shape index: {}]   ;;  %s830_s4 = inlined_call_operand.vmem [shape: f32[1,128], index: 4, kind: input, shape index: {}]   ;;  %s831_s5 = inlined_call_operand.vmem [shape: f32[1,128], index: 5, kind: input, shape index: {}]   ;;  %s832_s6 = inlined_call_operand.vmem [shape: f32[1,128], index: 6, kind: input, shape index: {}]   ;;  %s833_s7 = inlined_call_operand.hbm [shape: f32[8,128], index: 7, kind: output, shape index: {}]  }
   0x1   :  { %v28_v0 = vld [vmem:[%s827_s1] sm:$0xff]  ;;  %v29_v1 = vld [vmem:[%s827_s1 + $0x8] sm:$0xff]  ;;  %v30_v2 = vld [vmem:[%s827_s1 + $0x10] sm:$0xff]  ;;  %484 = vmatprep.subr.bf16.mxu0 %v584_v3  ;;  %411 = vmatprep.mubr.msk.f32.mxu0 %vm585_vm0, %v586_v6 }
   0x2   :  { %v485_v4 = vpack.c.bf16 %v29_v1, %v28_v0  ;;  %v31_v5 = vld [vmem:[%s827_s1 + $0x18] sm:$0xff]  ;;  %508 = vmatprep.subr.bf16.mxu1 %v584_v3  ;;  %446 = vmatprep.mubr.msk.f32.mxu1 %vm585_vm0, %v586_v6  ;;  %v32_v8 = vld [vmem:[%s827_s1 + $0x20] sm:$0xff]  ;;  %v33_v9 = vld [vmem:[%s827_s1 + $0x28] sm:$0xff] }
   0x3   :  { %v488_v7 = vpack.c.bf16 %v31_v5, %v30_v2  ;;  %v122_v10 = vld [vmem:[%s828_s2] sm:$0xff]  ;;  %v123_v11 = vld [vmem:[%s828_s2 + $0x8] sm:$0xff]  ;;  %v124_v12 = vld [vmem:[%s828_s2 + $0x10] sm:$0xff]  ;;  %v491_v14 = vpack.c.bf16 %v33_v9, %v32_v8 }
   0x4   :  { %486 = vmatpush3.bf16.msra.mxu0 %v485_v4  ;;  %v125_v13 = vld [vmem:[%s828_s2 + $0x18] sm:$0xff]  ;;  %v509_v15 = vpack.c.bf16 %v123_v11, %v122_v10  ;;  %v34_v16 = vld [vmem:[%s827_s1 + $0x30] sm:$0xff]  ;;  %v126_v19 = vld [vmem:[%s828_s2 + $0x20] sm:$0xff] }
   0x5   :  { %487 = vmatprep.subr.bf16.mxu0 %v584_v3  ;;  %v35_v17 = vld [vmem:[%s827_s1 + $0x38] sm:$0xff]  ;;  %v512_v18 = vpack.c.bf16 %v125_v13, %v124_v12  ;;  %v127_v20 = vld [vmem:[%s828_s2 + $0x28] sm:$0xff] }
   0x6   :  { %510 = vmatpush3.bf16.msra.mxu1 %v509_v15 }
   0x7   :  { %511 = vmatprep.subr.bf16.mxu1 %v584_v3 }
   0x8   :  { %489 = vmatpush3.bf16.msra.mxu0 %v488_v7 }
   0x9   :  { %490 = vmatprep.subr.bf16.mxu0 %v584_v3 }
   0xa   :  { %12 = vsyncpa [#allocation3], 0  ;;  %v494_v21 = vpack.c.bf16 %v35_v17, %v34_v16  ;;  %v36_v22 = vld [vmem:[%s827_s1 + $0x40] sm:$0xff]  ;;  %v37_v23 = vld [vmem:[%s827_s1 + $0x48] sm:$0xff]  ;;  %513 = vmatpush3.bf16.msra.mxu1 %v512_v18  ;;  %v515_v24 = vpack.c.bf16 %v127_v20, %v126_v19  ;;  %s587_s29 = smov [#allocation2]  }
   0xb   :  { %514 = vmatprep.subr.bf16.mxu1 %v584_v3  ;;  %v128_v25 = vld [vmem:[%s828_s2 + $0x30] sm:$0xff]  ;;  %v129_v26 = vld [vmem:[%s828_s2 + $0x38] sm:$0xff]  ;;  %v497_v27 = vpack.c.bf16 %v37_v23, %v36_v22  ;;  %v130_v31 = vld [vmem:[%s828_s2 + $0x40] sm:$0xff]  ;;  %s317_s30 = sshll.u32 %s587_s29, 4  ;;  %s318_s30 = int_to_ptr.vmem [resolvable:$true] %s317_s30 }
   0xc   :  { %492 = vmatpush3.bf16.msra.mxu0 %v491_v14  ;;  %v38_v28 = vld [vmem:[%s827_s1 + $0x50] sm:$0xff]  ;;  %v39_v29 = vld [vmem:[%s827_s1 + $0x58] sm:$0xff]  ;;  %v518_v30 = vpack.c.bf16 %v129_v26, %v128_v25  ;;  %v131_v32 = vld [vmem:[%s828_s2 + $0x48] sm:$0xff]  ;;  %p565_p1 = scmp.lt.s32.totalorder %s318_s30, %s318_s30 }
   0xd   :  { %493 = vmatprep.subr.bf16.mxu0 %v584_v3  ;;  %v500_v33 = vpack.c.bf16 %v39_v29, %v38_v28  ;;  %v40_v34 = vld [vmem:[%s827_s1 + $0x60] sm:$0xff]  ;;  %v41_v35 = vld [vmem:[%s827_s1 + $0x68] sm:$0xff]  ;;  %v521_v36 = vpack.c.bf16 %v131_v32, %v130_v31  ;;  %v132_v37 = vld [vmem:[%s828_s2 + $0x50] sm:$0xff] }
   0xe   :  { %516 = vmatpush3.bf16.msra.mxu1 %v515_v24  ;;  %v133_v38 = vld [vmem:[%s828_s2 + $0x58] sm:$0xff]  ;;  %v503_v39 = vpack.c.bf16 %v41_v35, %v40_v34  ;;  %v42_v40 = vld [vmem:[%s827_s1 + $0x70] sm:$0xff]  ;;  %v134_v43 = vld [vmem:[%s828_s2 + $0x60] sm:$0xff] }
   0xf   :  { %517 = vmatprep.subr.bf16.mxu1 %v584_v3  ;;  %v43_v41 = vld [vmem:[%s827_s1 + $0x78] sm:$0xff]  ;;  %v524_v42 = vpack.c.bf16 %v133_v38, %v132_v37  ;;  %v135_v44 = vld [vmem:[%s828_s2 + $0x68] sm:$0xff]  ;;  %v27_v47 = vld [vmem:[%s826_s0] sm:$0xff] }
  0x10   :  { %495 = vmatpush3.bf16.msra.mxu0 %v494_v21  ;;  %v506_v45 = vpack.c.bf16 %v43_v41, %v42_v40  ;;  %v527_v46 = vpack.c.bf16 %v135_v44, %v134_v43  ;;  %v136_v48 = vld [vmem:[%s828_s2 + $0x70] sm:$0xff]  ;;  %v137_v49 = vld [vmem:[%s828_s2 + $0x78] sm:$0xff]  ;;  %v216_v51 = vld [vmem:[%s829_s3] sm:$0xff] }
  0x11   :  { %496 = vmatprep.subr.bf16.mxu0 %v584_v3  ;;  %v530_v50 = vpack.c.bf16 %v137_v49, %v136_v48  ;;  %v217_v52 = vld [vmem:[%s829_s3 + $0x8] sm:$0xff]  ;;  %v218_v53 = vld [vmem:[%s829_s3 + $0x10] sm:$0xff]  ;;  %v219_v55 = vld [vmem:[%s829_s3 + $0x18] sm:$0xff] }
  0x12   :  { %519 = vmatpush3.bf16.msra.mxu1 %v518_v30  ;;  %v533_v54 = vpack.c.bf16 %v217_v52, %v216_v51  ;;  %v536_v56 = vpack.c.bf16 %v219_v55, %v218_v53  ;;  %v220_v57 = vld [vmem:[%s829_s3 + $0x20] sm:$0xff]  ;;  %v221_v58 = vld [vmem:[%s829_s3 + $0x28] sm:$0xff]  ;;  %v222_v60 = vld [vmem:[%s829_s3 + $0x30] sm:$0xff] }
  0x13   :  { %520 = vmatprep.subr.bf16.mxu1 %v584_v3  ;;  %v539_v59 = vpack.c.bf16 %v221_v58, %v220_v57  ;;  %v223_v61 = vld [vmem:[%s829_s3 + $0x38] sm:$0xff]  ;;  %v224_v63 = vld [vmem:[%s829_s3 + $0x40] sm:$0xff]  ;;  %v225_v0 = vld [vmem:[%s829_s3 + $0x48] sm:$0xff] }
  0x14   :  { %498 = vmatpush3.bf16.msra.mxu0 %v497_v27  ;;  %v542_v62 = vpack.c.bf16 %v223_v61, %v222_v60  ;;  %v545_v1 = vpack.c.bf16 %v225_v0, %v224_v63  ;;  %v226_v2 = vld [vmem:[%s829_s3 + $0x50] sm:$0xff]  ;;  %v227_v4 = vld [vmem:[%s829_s3 + $0x58] sm:$0xff]  ;;  %v229_v7 = vld [vmem:[%s829_s3 + $0x68] sm:$0xff] }
  0x15   :  { %499 = vmatprep.subr.bf16.mxu0 %v584_v3  ;;  %v548_v5 = vpack.c.bf16 %v227_v4, %v226_v2  ;;  %v325_v9 = vld [vmem:[%s830_s4] ss:$0 sm:$0xff]  ;;  %v230_v14 = vld [vmem:[%s829_s3 + $0x70] sm:$0xff]  ;;  %v231_v15 = vld [vmem:[%s829_s3 + $0x78] sm:$0xff] }
  0x16   :  { %522 = vmatpush3.bf16.msra.mxu1 %v521_v36  ;;  %v554_v16 = vpack.c.bf16 %v231_v15, %v230_v14  ;;  %v327_v21 = vld [vmem:[%s832_s6] ss:$0 sm:$0xff] }
  0x17   :  { %523 = vmatprep.subr.bf16.mxu1 %v584_v3 }
  0x18   :  { %501 = vmatpush3.bf16.msra.mxu0 %v500_v33 }
  0x19   :  { %502 = vmatprep.subr.bf16.mxu0 %v584_v3 }
  0x1a   :  { %525 = vmatpush3.bf16.msra.mxu1 %v524_v42 }
  0x1b   :  { %526 = vmatprep.subr.bf16.mxu1 %v584_v3 }
  0x1c   :  { %504 = vmatpush3.bf16.msra.mxu0 %v503_v39 }
  0x1d   :  { %505 = vmatprep.subr.bf16.mxu0 %v584_v3 }
  0x1e   :  { %528 = vmatpush3.bf16.msra.mxu1 %v527_v46 }
  0x1f   :  { %529 = vmatprep.subr.bf16.mxu1 %v584_v3 }
  0x20   :  { %507 = vmatpush3.bf16.msra.mxu0 %v506_v45 }
  0x21   :  { %532 = vmatprep.subr.bf16.mxu0 %v584_v3 }
  0x22   :  { %531 = vmatpush3.bf16.msra.mxu1 %v530_v50 }
  0x23   :  { %412 = vmatmul.mubr.f32.vlgmr.msra.gmra.mrb[0].mxu0 %v27_v47 }
  0x24   :  { %481 = vmatprep.mubr.msk.f32.mxu0 %vm585_vm0, %v586_v6  ;;  %534 = vmatpush3.bf16.msra.mxu0 %v533_v54  ;;  %v228_v6 = vld [vmem:[%s829_s3 + $0x60] sm:$0xff]  ;;  %s560_s3 = scalar_lea.vmem %s318_s30, 128 }
  0x25   :  { %535 = vmatprep.subr.bf16.mxu0 %v584_v3  ;;  %v551_v8 = vpack.c.bf16 %v229_v7, %v228_v6  ;;  %p561_p0 = scmp.ne.s32.totalorder %s318_s30, %s560_s3  ;;  %p566_p2 = scmp.lt.s32.totalorder %s560_s3, %s560_s3 }
  0x27   :  { %p567_p3 = por %p566_p2, %p565_p1 }
  0x28   :  { %537 = vmatpush3.bf16.msra.mxu0 %v536_v56 }
  0x29   :  { %538 = vmatprep.subr.bf16.mxu0 %v584_v3  ;;  %p568_p4 = pnand %p567_p3, %p561_p0 }
  0x2c   :  { %540 = vmatpush3.bf16.msra.mxu0 %v539_v59 }
  0x2d   :  { %541 = vmatprep.subr.bf16.mxu0 %v584_v3 }
  0x30   :  { %543 = vmatpush3.bf16.msra.mxu0 %v542_v62 }
  0x31   :  { %544 = vmatprep.subr.bf16.mxu0 %v584_v3 }
  0x34   :  { %546 = vmatpush3.bf16.msra.mxu0 %v545_v1 }
  0x35   :  { %547 = vmatprep.subr.bf16.mxu0 %v584_v3 }
  0x38   :  { %549 = vmatpush3.bf16.msra.mxu0 %v548_v5 }
  0x39   :  { %550 = vmatprep.subr.bf16.mxu0 %v584_v3 }
  0x3c   :  { %552 = vmatpush3.bf16.msra.mxu0 %v551_v8 }
  0x3d   :  { %553 = vmatprep.subr.bf16.mxu0 %v584_v3  ;;  %v326_v3 = vld [vmem:[%s831_s5] ss:$0 sm:$0xff] }
  0x40   :  { %555 = vmatpush3.bf16.msra.mxu0 %v554_v16 }
  0xf6   :  { %v117_v10 = vpop.f32.mrb[0].mxu0 }
  0xf7   :  { %v118_v11 = vadd.f32 %v325_v9, %v117_v10  ;;  %v413_v12 = vpop.f32.mrb[1].mxu0 }
  0xf9   :  { %v121_v13 = vmax.f32 %v118_v11, 0.0 }
  0xfb   :  { %447 = vmatmul.mubr.f32.vlgmr.msra.gmra.mrb[0].mxu1 %v121_v13 }
 0x1ce   :  { %v211_v17 = vpop.f32.mrb[0].mxu1 }
 0x1cf   :  { %v212_v18 = vadd.f32 %v326_v3, %v211_v17  ;;  %v448_v19 = vpop.f32.mrb[1].mxu1 }
 0x1d1   :  { %v215_v20 = vmax.f32 %v212_v18, 0.0 }
 0x1d3   :  { %482 = vmatmul.mubr.f32.vlgmr.msra.gmra.mrb[2].mxu0 %v215_v20 }
 0x2a6   :  { %v305_v22 = vpop.f32.mrb[2].mxu0 }
 0x2a7   :  { %v306_v23 = vadd.f32 %v327_v21, %v305_v22  ;;  %v483_v24 = vpop.f32.mrb[3].mxu0 }
 0x2a9   :  { %v309_v25 = vmax.f32 %v306_v23, 0.0 }
 0x2ab   :  { %310 = vst [vmem:[#allocation2] sm:$0xff] %v309_v25 }
 0x2ac   :  { %571 = shalt.err (!%p568_p4)
}
 0x2ad   :  { %s572_s9 = scalar_lea.hbm %s833_s7, 128 }
 0x2ae   :  { %p573_p5 = scmp.ne.s32.totalorder %s833_s7, %s572_s9  ;;  %p576_p6 = scmp.lt.u32.totalorder %s572_s9, %s833_s7 }
 0x2b0   :  { %p578_p7 = pnand %p576_p6, %p573_p5 }
 0x2b2   :  { %581 = shalt.err (!%p578_p7)
}
 0x2b3   :  { %320 = dma.vmem_to_hbm [thread:$0]  %s318_s30, 128, %s833_s7, [#allocation3]  }
 0x2b4   :  { %582 = dma.done.wait [#allocation3], 128  }
 0x2b5   :  { %583 = vsyncadd [#allocation3], 4294967168 }
 0x2b6   :  { %324 = vsyncpa [#allocation3], 1 }

</bundles_post_ra>
